<compile_context>
chip_gen: v7x
topology: tpu7x:2x2x1
jax: 0.10.0
libtpu: 0.0.40
codegen_flags: <defaults>
</compile_context>

<pallas_src>
import jax
import jax.numpy as jnp
from jax.experimental import pallas as pl
from jax.experimental.pallas import tpu as pltpu


def _dist_concat_kernel(mask_ref, x_ref, out_ref, acc_shift_ref, acc_lse_ref):
    # Grid: (M mask slots [parallel], N-row tiles [arbitrary/reduction]).
    del mask_ref  # only consumed by the index_maps (scalar prefetch)
    n_step = pl.program_id(1)

    @pl.when(n_step == 0)
    def _init():
        acc_shift_ref[...] = jnp.zeros_like(acc_shift_ref)
        acc_lse_ref[...] = jnp.zeros_like(acc_lse_ref)

    x = x_ref[...].astype(jnp.float32)                       # (A, 1, tn, C)

    # Row-wise log-softmax pieces, accumulated over the row (N) axis:
    #   log_p = (x - rowmax) - lse  =>  sum_n log_p = sum_n shifted - sum_n lse
    x_max = jnp.max(x, axis=-1, keepdims=True)               # (A, 1, tn, 1)
    shifted = x - x_max
    lse = jnp.log(jnp.sum(jnp.exp(shifted), axis=-1, keepdims=True))

    acc_shift_ref[...] += jnp.sum(shifted, axis=(1, 2))      # (A, C)
    acc_lse_ref[...] += jnp.sum(lse, axis=(1, 2))            # (A, 1)

    @pl.when(n_step == pl.num_programs(1) - 1)
    def _finalize():
        A = acc_shift_ref.shape[0]
        C = acc_shift_ref.shape[1]
        # log prod_n softmax(x)[n, :]  (== log of cumprod(...)[-1]), per attr.
        log_attr_p = acc_shift_ref[...] - acc_lse_ref[...]   # (A, C)
        # log of the attribute-mean distribution via logsumexp over attributes.
        g = jnp.max(log_attr_p, axis=0, keepdims=True)       # (1, C)
        log_m = (g
                 + jnp.log(jnp.sum(jnp.exp(log_attr_p - g), axis=0,
                                   keepdims=True))
                 - jnp.log(jnp.float32(A)))                  # (1, C)
        m = jnp.exp(log_m)                                   # (1, C)
        # (1/A) * sum_i F.kl_div(log attr_p_i, m, 'batchmean') with 1-D inputs
        # of length C  =>  divide by A * C.
        kl = jnp.sum(m * (log_m - log_attr_p))
        out_ref[...] = jnp.full((1, 1, 1), kl * (1.0 / (A * C)),
                                dtype=jnp.float32)


def _pick_row_tile(n, max_rows):
    """Largest row-tile that divides N and satisfies the (8, 128) tiling rule."""
    if n <= max_rows:
        return n
    for t in range(max_rows - max_rows % 8, 7, -8):
        if n % t == 0:
            return t
    return n  # no aligned divisor: fall back to a single block over all rows


def distribution_concate_v4(net_logits, mask_nums, *, max_tile_rows=512):
    """net_logits: (A, K, N, C); mask_nums: (M,) int -> scalar loss (batchmean)."""
    A, K, N, C = net_logits.shape
    M = int(mask_nums.shape[0])
    if M == 0:
        # PyTorch would raise (final_loss never defined); return a benign 0.0.
        return jnp.float32(0.0)

    mask_nums = mask_nums.astype(jnp.int32)
    tn = _pick_row_tile(N, max_tile_rows)
    n_steps = N // tn

    cost = pl.CostEstimate(
        flops=8 * A * M * N * C,
        transcendentals=A * M * N * C + A * M * N + 2 * A * M * C + 2 * M * C,
        bytes_accessed=A * M * N * C * net_logits.dtype.itemsize + 8 * M,
    )

    grid_spec = pltpu.PrefetchScalarGridSpec(
        num_scalar_prefetch=1,
        grid=(M, n_steps),
        in_specs=[
            # Fused gather: block (A, 1, tn, C) taken at K-slot mask[i].
            pl.BlockSpec((A, 1, tn, C), lambda i, n, mask: (0, mask[i], n, 0)),
        ],
        # Rank-3 output so the per-k (1, 1, 1) block's last two dims equal the
        # full array dims (keeps the (8, 128) tiling rule satisfied).
        out_specs=pl.BlockSpec((1, 1, 1), lambda i, n, mask: (i, 0, 0)),
        scratch_shapes=[
            pltpu.VMEM((A, C), jnp.float32),   # sum_n (x - rowmax)
            pltpu.VMEM((A, 1), jnp.float32),   # sum_n logsumexp(row)
        ],
    )

    per_k = pl.pallas_call(
        _dist_concat_kernel,
        out_shape=jax.ShapeDtypeStruct((M, 1, 1), jnp.float32),
        grid_spec=grid_spec,
        compiler_params=pltpu.CompilerParams(
            dimension_semantics=("parallel", "arbitrary"),
        ),
        cost_estimate=cost,
    )(mask_nums, net_logits)

    # final_loss = sum_k loss_k
    return jnp.sum(per_k)


def _reference(net_logits, mask_nums):
    # pure-JAX reimplementation of the PyTorch forward for verification
    A = net_logits.shape[0]
    C = net_logits.shape[-1]
    total = jnp.float32(0.0)
    for k in list(mask_nums):
        probs = jax.nn.softmax(net_logits[:, int(k)], axis=-1)   # (A, N, C)
        attr_p = jnp.prod(probs, axis=1)                          # (A, C)
        m = jnp.mean(attr_p, axis=0, keepdims=True)               # (1, C)
        kl = jnp.sum(m * (jnp.log(m) - jnp.log(attr_p))) / C      # sum_i batchmean
        total = total + kl / A
    return total


if __name__ == "__main__":
    key = jax.random.PRNGKey(0)
    A, K, N, C = 3, 4, 16, 16          # 3 attributes, 4 mask slots, (16, 16) logits
    net_logits = jax.random.normal(key, (A, K, N, C), dtype=jnp.float32)
    mask_nums = jnp.array([1, 3], dtype=jnp.int32)

    # max_tile_rows=8 forces two N steps so the accumulate/finalize reduction
    # path is exercised even at these tiny shapes.
    loss = distribution_concate_v4(net_logits, mask_nums, max_tile_rows=8)
    loss = jax.block_until_ready(loss)

    ref = _reference(net_logits, mask_nums)
    assert jnp.allclose(loss, ref, rtol=2e-3, atol=1e-6), (loss, ref)
    print("KERNEL_OK")
</pallas_src>

<mosaic_0001>
module attributes {stable_mosaic.version = 11 : i64} {
  func.func @_dist_concat_kernel(%arg0: i32, %arg1: i32, %arg2: memref<2xi32, #tpu.memory_space<smem>>, %arg3: memref<3x1x8x16xf32, #tpu.memory_space<vmem>>, %arg4: memref<1x1x1xf32, #tpu.memory_space<vmem>>, %arg5: memref<3x16xf32, #tpu.memory_space<vmem>>, %arg6: memref<3x1xf32, #tpu.memory_space<vmem>>) attributes {dimension_semantics = [#tpu.dimension_semantics<parallel>, #tpu.dimension_semantics<arbitrary>], iteration_bounds = array<i64: 2, 2>, scalar_prefetch = 1 : i64, scratch_operands = 2 : i64, tpu.core_type = #tpu.core_type<tc>, window_params = [{transform_indices = @transform_0, window_bounds = array<i64: 3, 1, 8, 16>}, {transform_indices = @transform_1, window_bounds = array<i64: 1, 1, 1>}]} {
    %c0_i32 = arith.constant 0 : i32
    %0 = arith.cmpi eq, %arg1, %c0_i32 : i32
    %1 = arith.extui %0 : i1 to i32
    %c0_i32_0 = arith.constant 0 : i32
    %2 = arith.cmpi ne, %1, %c0_i32_0 : i32
    scf.if %2 {
      %cst_16 = arith.constant 0.000000e+00 : f32
      %23 = vector.broadcast %cst_16 : f32 to vector<3x16xf32>
      %c0_17 = arith.constant 0 : index
      %c0_18 = arith.constant 0 : index
      %24 = vector.load %arg5[%c0_17, %c0_18] : memref<3x16xf32, #tpu.memory_space<vmem>>, vector<3x16xf32>
      tpu.vector_store %arg5[%c0_17, %c0_18], %23 {strides = array<i32>} : memref<3x16xf32, #tpu.memory_space<vmem>>, vector<3x16xf32>,
      %cst_19 = arith.constant 0.000000e+00 : f32
      %25 = vector.broadcast %cst_19 : f32 to vector<3x1xf32>
      %c0_20 = arith.constant 0 : index
      %c0_21 = arith.constant 0 : index
      %26 = vector.load %arg6[%c0_20, %c0_21] : memref<3x1xf32, #tpu.memory_space<vmem>>, vector<3x1xf32>
      tpu.vector_store %arg6[%c0_20, %c0_21], %25 {strides = array<i32>} : memref<3x1xf32, #tpu.memory_space<vmem>>, vector<3x1xf32>,
    } else {
    }
    %c0 = arith.constant 0 : index
    %c0_1 = arith.constant 0 : index
    %c0_2 = arith.constant 0 : index
    %c0_3 = arith.constant 0 : index
    %3 = vector.load %arg3[%c0, %c0_1, %c0_2, %c0_3] : memref<3x1x8x16xf32, #tpu.memory_space<vmem>>, vector<3x1x8x16xf32>
    %cst = arith.constant dense<0xFF800000> : vector<3x1x8xf32>
    %4 = vector.multi_reduction <maximumf>, %3, %cst [3] : vector<3x1x8x16xf32> to vector<3x1x8xf32>
    %5 = vector.shape_cast %4 : vector<3x1x8xf32> to vector<3x1x8x1xf32>
    %6 = vector.broadcast %5 : vector<3x1x8x1xf32> to vector<3x1x8x16xf32>
    %7 = arith.subf %3, %6 : vector<3x1x8x16xf32>
    %8 = math.exp %7 : vector<3x1x8x16xf32>
    %cst_4 = arith.constant dense<0.000000e+00> : vector<3x1x8xf32>
    %9 = vector.multi_reduction <add>, %8, %cst_4 [3] : vector<3x1x8x16xf32> to vector<3x1x8xf32>
    %10 = vector.shape_cast %9 : vector<3x1x8xf32> to vector<3x1x8x1xf32>
    %11 = math.log %10 : vector<3x1x8x1xf32>
    %c0_5 = arith.constant 0 : index
    %c0_6 = arith.constant 0 : index
    %12 = vector.load %arg5[%c0_5, %c0_6] : memref<3x16xf32, #tpu.memory_space<vmem>>, vector<3x16xf32>
    %cst_7 = arith.constant dense<0.000000e+00> : vector<3x16xf32>
    %13 = vector.multi_reduction <add>, %7, %cst_7 [1, 2] : vector<3x1x8x16xf32> to vector<3x16xf32>
    %14 = arith.addf %12, %13 : vector<3x16xf32>
    %c0_8 = arith.constant 0 : index
    %c0_9 = arith.constant 0 : index
    %15 = vector.load %arg5[%c0_8, %c0_9] : memref<3x16xf32, #tpu.memory_space<vmem>>, vector<3x16xf32>
    tpu.vector_store %arg5[%c0_8, %c0_9], %14 {strides = array<i32>} : memref<3x16xf32, #tpu.memory_space<vmem>>, vector<3x16xf32>,
    %c0_10 = arith.constant 0 : index
    %c0_11 = arith.constant 0 : index
    %16 = vector.load %arg6[%c0_10, %c0_11] : memref<3x1xf32, #tpu.memory_space<vmem>>, vector<3x1xf32>
    %cst_12 = arith.constant dense<0.000000e+00> : vector<3x1xf32>
    %17 = vector.multi_reduction <add>, %11, %cst_12 [1, 2] : vector<3x1x8x1xf32> to vector<3x1xf32>
    %18 = arith.addf %16, %17 : vector<3x1xf32>
    %c0_13 = arith.constant 0 : index
    %c0_14 = arith.constant 0 : index
    %19 = vector.load %arg6[%c0_13, %c0_14] : memref<3x1xf32, #tpu.memory_space<vmem>>, vector<3x1xf32>
    tpu.vector_store %arg6[%c0_13, %c0_14], %18 {strides = array<i32>} : memref<3x1xf32, #tpu.memory_space<vmem>>, vector<3x1xf32>,
    %c1_i32 = arith.constant 1 : i32
    %20 = arith.cmpi eq, %arg1, %c1_i32 : i32
    %21 = arith.extui %20 : i1 to i32
    %c0_i32_15 = arith.constant 0 : i32
    %22 = arith.cmpi ne, %21, %c0_i32_15 : i32
    scf.if %22 {
      %c0_16 = arith.constant 0 : index
      %c0_17 = arith.constant 0 : index
      %23 = vector.load %arg5[%c0_16, %c0_17] : memref<3x16xf32, #tpu.memory_space<vmem>>, vector<3x16xf32>
      %c0_18 = arith.constant 0 : index
      %c0_19 = arith.constant 0 : index
      %24 = vector.load %arg6[%c0_18, %c0_19] : memref<3x1xf32, #tpu.memory_space<vmem>>, vector<3x1xf32>
      %25 = vector.broadcast %24 : vector<3x1xf32> to vector<3x16xf32>
      %26 = arith.subf %23, %25 : vector<3x16xf32>
      %cst_20 = arith.constant dense<0xFF800000> : vector<16xf32>
      %27 = vector.multi_reduction <maximumf>, %26, %cst_20 [0] : vector<3x16xf32> to vector<16xf32>
      %28 = vector.shape_cast %27 : vector<16xf32> to vector<1x16xf32>
      %29 = vector.broadcast %28 : vector<1x16xf32> to vector<3x16xf32>
      %30 = arith.subf %26, %29 : vector<3x16xf32>
      %31 = math.exp %30 : vector<3x16xf32>
      %cst_21 = arith.constant dense<0.000000e+00> : vector<16xf32>
      %32 = vector.multi_reduction <add>, %31, %cst_21 [0] : vector<3x16xf32> to vector<16xf32>
      %33 = vector.shape_cast %32 : vector<16xf32> to vector<1x16xf32>
      %34 = math.log %33 : vector<1x16xf32>
      %35 = arith.addf %28, %34 : vector<1x16xf32>
      %cst_22 = arith.constant 3.000000e+00 : f32
      %36 = math.log %cst_22 : f32
      %37 = vector.broadcast %36 : f32 to vector<1x16xf32>
      %38 = arith.subf %35, %37 : vector<1x16xf32>
      %39 = math.exp %38 : vector<1x16xf32>
      %40 = vector.broadcast %38 : vector<1x16xf32> to vector<3x16xf32>
      %41 = arith.subf %40, %26 : vector<3x16xf32>
      %42 = vector.broadcast %39 : vector<1x16xf32> to vector<3x16xf32>
      %43 = arith.mulf %42, %41 : vector<3x16xf32>
      %44 = vector.shape_cast %43 : vector<3x16xf32> to vector<1x3x16xf32>
      %cst_23 = arith.constant dense<0.000000e+00> : vector<1xf32>
      %45 = vector.multi_reduction <add>, %44, %cst_23 [1, 2] : vector<1x3x16xf32> to vector<1xf32>
      %46 = vector.shape_cast %45 : vector<1xf32> to vector<1x1x1xf32>
      %47 = vector.extract %46[0, 0, 0] : f32 from vector<1x1x1xf32>
      %cst_24 = arith.constant 0.020833334 : f32
      %48 = arith.mulf %47, %cst_24 : f32
      %49 = vector.broadcast %48 : f32 to vector<1x1x1xf32>
      %c0_25 = arith.constant 0 : index
      %c0_26 = arith.constant 0 : index
      %c0_27 = arith.constant 0 : index
      %50 = vector.load %arg4[%c0_25, %c0_26, %c0_27] : memref<1x1x1xf32, #tpu.memory_space<vmem>>, vector<1x1x1xf32>
      tpu.vector_store %arg4[%c0_25, %c0_26, %c0_27], %49 {strides = array<i32>} : memref<1x1x1xf32, #tpu.memory_space<vmem>>, vector<1x1x1xf32>,
    } else {
    }
    return
  }
  func.func @transform_0(%arg0: i32, %arg1: i32, %arg2: memref<2xi32, #tpu.memory_space<smem>>) -> (i32, i32, i32, i32) {
    %0 = arith.index_cast %arg0 : i32 to index
    %1 = memref.load %arg2[%0] : memref<2xi32, #tpu.memory_space<smem>>
    %c0_i32 = arith.constant 0 : i32
    %c0_i32_0 = arith.constant 0 : i32
    %c0_i32_1 = arith.constant 0 : i32
    return %c0_i32, %1, %arg1, %c0_i32_0 : i32, i32, i32, i32
  }
  func.func @transform_1(%arg0: i32, %arg1: i32, %arg2: memref<2xi32, #tpu.memory_space<smem>>) -> (i32, i32, i32) {
    %c0_i32 = arith.constant 0 : i32
    %c0_i32_0 = arith.constant 0 : i32
    %c0_i32_1 = arith.constant 0 : i32
    return %arg0, %c0_i32, %c0_i32_0 : i32, i32, i32
  }
}

</mosaic_0001>

<bundles_post_ra>
// kernel: tpu_custom_call.1
= control target key start
LH: loop header
LB: loop body
LE: loop exit
PB: predicated region body
PF: predicated region fallthrough
CT: control target
= control target key end

     0   :  { %s830_s0 = inlined_call_operand.hbm [shape: s32[2], index: 0, kind: input, shape index: {}]   ;;  %s831_s1 = inlined_call_operand.hbm [shape: f32[3,4,16,16], index: 1, kind: input, shape index: {}]   ;;  %s832_s2 = inlined_call_operand.vmem [shape: f32[2,1,1], index: 2, kind: output, shape index: {}]  }
   0x1   :  { %s502_s11 = scalar_lea.hbm %s830_s0, 16 }
   0x2   :  { %p503_p0 = scmp.ne.s32.totalorder %s830_s0, %s502_s11  ;;  %p506_p1 = scmp.lt.u32.totalorder %s502_s11, %s830_s0 }
   0x4   :  { %p508_p2 = pnand %p506_p1, %p503_p0 }
   0x6   :  { %511 = shalt.err (!%p508_p2)  }
   0x7   :  { %s612_s16 = smov [#allocation5]  }
   0x8   :  { %8 = dma.hbm_to_smem %s830_s0, 16, %s612_s16, [#allocation4] }
   0x9   :  { %574 = dma.done.wait [#allocation4], 16 }
   0xa   :  { %575 = vsyncadd [#allocation4], 4294967280 }
   0xb   :  { %10 = sfence }
   0xc   :  { %11 = vsyncpa [#allocation7], 0 }
   0xd   :  { %13 = vsyncpa [#allocation7 + $0x1], 0  ;;  %s646_s19 = smov 0   ;;  %s648_s20 = smov 0  }
   0xe   :  { %s650_s21 = smov 0   ;;  %s652_s22 = smov 0  }
   0xf   :  { %s654_s23 = smov 0   ;;  %s656_s24 = smov 0  }
  0x10   :  { %s658_s25 = smov 0   ;;  %s660_s0 = smov 0  }
  0x11 LB: > { %s28_s26 = sadd.s32 1, %s602_s24  ;;  %s31_s27 = sadd.s32 1, %s606_s25  ;;  %s610_s0 = sphi %s660_s0, %s19_s0   ;;  %s606_s25 = sphi %s658_s25, %s845_s25   ;;  %s602_s24 = sphi %s656_s24, %s844_s24   ;;  %s598_s23 = sphi %s654_s23, %s843_s23   ;;  %s594_s22 = sphi %s652_s22, %s842_s22   ;;  %s590_s21 = sphi %s650_s21, %s841_s21   ;;  %s586_s20 = sphi %s648_s20, %s840_s20   ;;  %s582_s19 = sphi %s646_s19, %s839_s19  }
  0x12   : > { %p29_p3 = scmp.ge.s32.totalorder %s28_s26, 2  ;;  %s386_s28 = sadd.s32 4294967295, %s610_s0  }
  0x13   : > { %s35_s29 = sld [smem:[#allocation5 + %s606_s25]]  ;;  %p49_p4 = scmp.ne.s32.totalorder %s590_s21, %s586_s20 }
  0x14   : > { %s847_s26 = smov (%p29_p3, %s28_s26), 0  ;;  %s849_s27 = smov (!%p29_p3, %s31_s27), %s606_s25 }
  0x15   : > { %p33_p5 = scmp.ge.s32.totalorder %s849_s27, 2  ;;  %p50_p6 = scmp.eq.s32.totalorder %s610_s0, 0 }
  0x16   : > { %p55_p7 = scmp.ne.s32.totalorder %s586_s20, %s582_s19  ;;  %p56_p8 = scmp.eq.s32.totalorder %s386_s28, 0 }
  0x17   : > { %s851_s27 = smov (%p33_p5, %s849_s27), 0  ;;  %p697_p9 = por %p50_p6, %p49_p4 }
  0x18   : > { %p701_p10 = por %p56_p8, %p55_p7  ;;  %s36_s4 = sld [smem:[#allocation5 + %s851_s27]] }
  0x19   : > { %s38_s5 = ssub.s32 %s602_s24, %s847_s26  ;;  %p412_p11 = scmp.lt.s32.totalorder %s610_s0, 4 }
  0x1a   : > { %s835_s3 = scalar_select %p701_p10, 1, 0 }
  0x1b   : > { %s402_s6 = scalar_select %p697_p9, [#allocation5], [#allocation8] }
  0x1c   : > { %s105_s7 = sand.u32 1, %s590_s21   ;;  %p714_p12 = pnand %p412_p11, %p697_p9 }
  0x1d   : > { %s403_s9 = scalar_select %p697_p9, %s606_s25, 0 }
  0x1e   : > { %s37_s10 = ssub.s32 %s35_s29, %s36_s4  ;;  %s42_s11 = sadd.s32 1, %s590_s21 }
  0x1f   : > { %s39_s12 = sor.u32 %s38_s5, %s37_s10  ;;  %s398_s13 = smul.u32 24, %s105_s7 }
  0x20   : > { %p40_p13 = scmp.eq.s32.totalorder %s39_s12, 0  ;;  %s853_s6 = smov (!%p412_p11, %s402_s6), [#allocation9] }
  0x21   : > { %s855_s9 = smov (!%p412_p11, %s403_s9), 0  ;;  %p392_p0 = scmp.ge.s32.totalorder %s610_s0, 1 }
  0x22   : > { %s723_s14 = scalar_select %p40_p13, %s590_s21, %s42_s11  }
  0x23   : > { %s110_s15 = sld [smem:[%s853_s6 + %s855_s9]]  ;;  %p126_p1 = scmp.lt.s32.totalorder %s610_s0, 5 }
  0x24   : > { %s109_s16 = scalar_lea.vmem [#allocation6], %s398_s13  ;;  %s739_s6 = scalar_lea.sflag [#allocation7], %s105_s7 }
  0x25   : > { %s118_s17 = sshll.u32 %s109_s16, 4  ;;  %p727_p2 = pnand %p392_p0, %p126_p1  ;;  %s731_s17 = int_to_ptr.vmem [resolvable:$true] %s118_s17 }
  0x26   : > { %p514_p4 = pneg %p714_p12  ;;  %s517_s12 = scalar_lea.hbm %s831_s1, 3072 }
  0x29   : > { %s390_s19 = sshll.u32 %s110_s15, 1 }
  0x2a   : > { %s115_s28 = sadd.s32 %s602_s24, %s390_s19 }
  0x2b   : > { %s391_s29 = sshll.u32 %s115_s28, 7 }
  0x2c   : > { %s737_s5 = scalar_lea.hbm %s831_s1, %s391_s29 }
  0x2d   : > { %s512_s9 = scalar_lea.hbm %s737_s5, 384  ;;  %p518_p7 = scmp.lt.u32.totalorder %s737_s5, %s831_s1 }
  0x2e   : > { %p513_p3 = scmp.ne.s32.totalorder %s737_s5, %s512_s9  ;;  %p519_p8 = scmp.lt.u32.totalorder %s517_s12, %s512_s9 }
  0x2f   : > { %p521_p11 = scmp.lt.u32.totalorder %s512_s9, %s737_s5 }
  0x30   : > { %p515_p5 = pnand %p514_p4, %p513_p3  ;;  %p520_p9 = por %p519_p8, %p518_p7 }
  0x32   : > { %p516_p6 = pneg %p515_p5  ;;  %p522_p13 = por %p521_p11, %p520_p9 }
  0x34   : > { %p523_p0 = pnand %p522_p13, %p516_p6 }
  0x36   : > { %526 = shalt.err (!%p523_p0)
}
  0x37   : > { %s527_s7 = scalar_lea.vmem %s731_s17, 384  ;;  %s613_s16 = smov [#allocation6]  }
  0x38   : > { %p528_p1 = scmp.ne.s32.totalorder %s731_s17, %s527_s7  ;;  %s532_s19 = sshll.u32 %s613_s16, 4  ;;  %s533_s19 = int_to_ptr.vmem [resolvable:$false] %s532_s19 }
  0x39   : > { %s534_s28 = scalar_lea.vmem %s533_s19, 768  ;;  %p535_p10 = scmp.lt.s32.totalorder %s731_s17, %s533_s19 }
  0x3a   : > { %p530_p3 = pnand %p528_p1, %p514_p4  ;;  %p536_p7 = scmp.lt.s32.totalorder %s534_s28, %s527_s7 }
  0x3c   : > { %p531_p5 = pneg %p530_p3  ;;  %p537_p8 = por %p536_p7, %p535_p10 }
  0x3e   : > { %p538_p9 = pnand %p537_p8, %p531_p5 }
  0x40   : > { %541 = shalt.err (!%p538_p9)
}
  0x41   : > { %s614_s29 = smov 1024   ;;  %s615_s30 = smov 128  }
  0x42   : > { %s616_s4 = smov 8   ;;  %130 = sbr.rel (%p727_p2) target bundleno = 838 (0x346), region = 24 }
  0x43   : > { %411 = dma.hbm_to_vmem [thread:$0]  (!%p714_p12), %s737_s5, 384, %s731_s17, %s739_s6, %s614_s29, %s615_s30, %s616_s4  }
  0x44   : > { %s132_s9 = sand.u32 (!%p727_p2), 1, %s586_s20   ;;  %p838_p10 = scmp.ne.s32.totalorder (!%p727_p2), %s835_s3, 0 }
  0x45   : > { %s399_s10 = smul.u32 (!%p727_p2), 24, %s132_s9  ;;  %s133_s11 = scalar_lea.sflag (!%p727_p2), [#allocation7], %s132_s9 }
  0x47   : > { %s136_s12 = scalar_lea.vmem (!%p727_p2), [#allocation6], %s399_s10 }
  0x49   : > { %577 = dma.done.wait (%p838_p10), %s133_s11, 384  }
  0x4a   : > { %579 = vsyncadd (%p838_p10), %s133_s11, 4294966912  ;;  %p154_p4 = scmp.lt.s32.totalorder %s598_s23, 1  ;;  %p393_p12 = scmp.ne.s32.totalorder %s594_s22, 0 }
  0x4b   : > { %vm161_vm0 = vcmask (!%p393_p12), 124928   ;;  %vm163_vm1 = vcmask (!%p393_p12), 2048   ;;  %v617_v0 = vmov (!%p393_p12), 0.0  }
  0x4c   : > { %s857_s23 = smov (!%p154_p4, %s598_s23), 1  ;;  %160 = sbr.rel (%p393_p12) target bundleno = 83 (0x53), region = 32 }
  0x4d   : > { %s156_s18 = scalar_lea.vmem %s832_s2, %s857_s23  ;;  %162 = vst.msk [vmem:[#allocation2] sm:$0x7] (!%p393_p12), %vm161_vm0, %v617_v0 }
  0x4e   : > { %164 = vst.msk [vmem:[#allocation3] sm:$0x7] (!%p393_p12), %vm163_vm1, %v617_v0 }
  0x53 PF: > { %v167_v1 = vld [vmem:[%s136_s12 + $0x10] sm:$0xff]  ;;  %vm168_vm2 = vcmask 130048   ;;  %v165_v2 = vld [vmem:[%s136_s12] sm:$0xff]  ;;  %v166_v3 = vld [vmem:[%s136_s12 + $0x8] sm:$0xff]  ;;  %vm227_vm3 = vcmask 1041409   ;;  %vm229_vm4 = vcmask 1042434  }
  0x54   : > { %v175_v4 = vsel %vm168_vm2, %v167_v1, -inf  ;;  %v169_v5 = vsel %vm168_vm2, %v165_v2, -inf  ;;  %v172_v6 = vsel %vm168_vm2, %v166_v3, -inf  ;;  %v202_v41 = vld [vmem:[#allocation2] sm:$0x7]  ;;  %vm233_vm5 = vcmask 124928  }
  0x55   : > { %176 = vmax.xlane.f32.xlu1 %v175_v4  ;;  %170 = vmax.xlane.f32.xlu0 %v169_v5  ;;  %vm261_vm6 = vcmask 2048   ;;  %p394_p2 = scmp.ne.s32.totalorder %s594_s22, 1 }
  0x56   : > { %vm312_vm7 = vcmask (!%p394_p2), 0  }
  0x59   : > { %173 = vmax.xlane.f32.xlu0 %v172_v6 }
  0xe2   : > { %v177_v7 = vpop.xlane.xlu1 %176  ;;  %v171_v8 = vpop.xlane.xlu0 %170 }
  0xe3   : > { %v180_v9 = vsub.f32 %v167_v1, %v177_v7  ;;  %v178_v10 = vsub.f32 %v165_v2, %v171_v8 }
  0xe5   : > { %v185_v11 = vmul.f32 1.442695, %v180_v9  ;;  %v217_v12 = vsel %vm168_vm2, %v180_v9, 0.0  ;;  %v181_v13 = vmul.f32 1.442695, %v178_v10  ;;  %v203_v14 = vsel %vm168_vm2, %v178_v10, 0.0 }
  0xe6   : > { %v218_v15 = vrot.slane %v217_v12, 4  ;;  %v204_v16 = vrot.slane %v203_v14, 4  ;;  %v174_v17 = vpop.xlane.xlu0 %173  ;;  %v235_v10 = vld [vmem:[#allocation3] sm:$0x7] }
  0xe7   : > { %483 = vpow2.f32 %v185_v11  ;;  %v179_v18 = vsub.f32 %v166_v3, %v174_v17 }
  0xe8   : > { %v219_v19 = vadd.f32 %v218_v15, %v217_v12  ;;  %485 = vpow2.f32 %v181_v13  ;;  %v205_v20 = vadd.f32 %v204_v16, %v203_v14  ;;  %v618_v15 = vmov (!%p394_p2), 0  }
  0xe9   : > { %v183_v21 = vmul.f32 1.442695, %v179_v18  ;;  %v210_v22 = vsel %vm168_vm2, %v179_v18, 0.0  ;;  %495 = vset.pattern.permute.xlu0 (!%p394_p2), %v618_v15 }
  0xea   : > { %v220_v23 = vrot.slane %v219_v19, 2  ;;  %v206_v24 = vrot.slane %v205_v20, 2  ;;  %v211_v25 = vrot.slane %v210_v22, 4 }
  0xeb   : > { %487 = vpow2.f32 %v183_v21 }
  0xec   : > { %v207_v26 = vadd.f32 %v206_v24, %v205_v20  ;;  %v212_v27 = vadd.f32 %v211_v25, %v210_v22  ;;  %v221_v28 = vadd.f32 %v220_v23, %v219_v19 }
  0xee   : > { %v213_v29 = vrot.slane %v212_v27, 2  ;;  %v208_v30 = vrot.slane %v207_v26, 1  ;;  %v222_v33 = vrot.slane %v221_v28, 1 }
  0xf0   : > { %v214_v31 = vadd.f32 %v213_v29, %v212_v27  ;;  %v209_v37 = vadd.f32 %v208_v30, %v207_v26  ;;  %v223_v40 = vadd.f32 %v222_v33, %v221_v28 }
  0xf1   : > { %v484_v32 = vpop.eup %483 }
  0xf2   : > { %v486_v34 = vpop.eup %485  ;;  %v215_v35 = vrot.slane %v214_v31, 1  ;;  %v193_v42 = vsel %vm168_vm2, %v484_v32, 0.0 }
  0xf3   : > { %v187_v36 = vsel %vm168_vm2, %v486_v34, 0.0 }
  0xf4   : > { %v216_v38 = vadd.f32 %v215_v35, %v214_v31  ;;  %188 = vadd.xlane.f32.xlu1 %v187_v36 }
  0xf5   : > { %v488_v39 = vpop.eup %487 }
  0xf6   : > { %v228_v43 = vsel %vm227_vm3, %v216_v38, %v209_v37  ;;  %v190_v44 = vsel %vm168_vm2, %v488_v39, 0.0 }
  0xf7   : > { %v230_v45 = vsel %vm229_vm4, %v223_v40, %v228_v43  ;;  %191 = vadd.xlane.f32.xlu0 %v190_v44 }
  0xf8   : > { %v232_v46 = vadd.f32 %v230_v45, %v202_v41  ;;  %194 = vadd.xlane.f32.xlu1 %v193_v42 }
  0xfa   : > { %234 = vst.msk [vmem:[#allocation2] sm:$0x7] %vm233_vm5, %v232_v46 }
 0x101   : > { %v267_v16 = vld [vmem:[#allocation2] sm:$0x7] (!%p394_p2) }
 0x181   : > { %v189_v47 = vpop.xlane.xlu1 %188 }
 0x182   : > { %489 = vlog2.f32 %v189_v47 }
 0x184   : > { %v192_v48 = vpop.xlane.xlu0 %191 }
 0x185   : > { %v195_v49 = vpop.xlane.xlu1 %194  ;;  %491 = vlog2.f32 %v192_v48 }
 0x186   : > { %493 = vlog2.f32 %v195_v49 }
 0x18c   : > { %v490_v50 = vpop.eup %489 }
 0x18d   : > { %v197_v51 = vmul.f32 0.6931472, %v490_v50 }
 0x18f   : > { %v492_v52 = vpop.eup %491  ;;  %v236_v53 = vrot.slane %v197_v51, 4 }
 0x190   : > { %v494_v54 = vpop.eup %493  ;;  %v199_v55 = vmul.f32 0.6931472, %v492_v52 }
 0x191   : > { %v237_v56 = vadd.f32 %v236_v53, %v197_v51  ;;  %v201_v57 = vmul.f32 0.6931472, %v494_v54 }
 0x192   : > { %v242_v58 = vrot.slane %v199_v55, 4 }
 0x193   : > { %v238_v59 = vrot.slane %v237_v56, 2  ;;  %v248_v60 = vrot.slane %v201_v57, 4 }
 0x194   : > { %v243_v61 = vadd.f32 %v242_v58, %v199_v55 }
 0x195   : > { %v239_v62 = vadd.f32 %v238_v59, %v237_v56  ;;  %v249_v63 = vadd.f32 %v248_v60, %v201_v57 }
 0x196   : > { %v244_v0 = vrot.slane %v243_v61, 2 }
 0x197   : > { %v250_v1 = vrot.slane %v249_v63, 2  ;;  %v240_v2 = vrot.slane %v239_v62, 1 }
 0x198   : > { %v245_v3 = vadd.f32 %v244_v0, %v243_v61 }
 0x199   : > { %v251_v4 = vadd.f32 %v250_v1, %v249_v63  ;;  %v241_v7 = vadd.f32 %v240_v2, %v239_v62 }
 0x19a   : > { %v246_v5 = vrot.slane %v245_v3, 1 }
 0x19b   : > { %v252_v6 = vrot.slane %v251_v4, 1 }
 0x19c   : > { %v247_v8 = vadd.f32 %v246_v5, %v245_v3  ;;  %266 = sbr.rel (%p394_p2) target bundleno = 838 (0x346), region = 36 }
 0x19d   : > { %v253_v9 = vadd.f32 %v252_v6, %v251_v4 }
 0x19e   : > { %v257_v11 = vsel %vm227_vm3, %v247_v8, %v241_v7 }
 0x19f   : > { %v258_v12 = vsel %vm229_vm4, %v253_v9, %v257_v11 }
 0x1a0   : > { %v260_v13 = vadd.f32 %v258_v12, %v235_v10 }
 0x1a2   : > { %262 = vst.msk [vmem:[#allocation3] sm:$0x7] %vm261_vm6, %v260_v13 }
 0x1a9   : > { %v268_v14 = vld [vmem:[#allocation3] sm:$0x7] }
 0x1aa   : > { %271 = vperm.xlu0 %495, %v268_v14  }
 0x229   : > { %v272_v17 = vpop.permute.xlu0 %271 }
 0x22a   : > { %v274_v18 = vsub.f32 %v267_v16, %v272_v17 }
 0x22c   : > { %v275_v19 = vsel %vm233_vm5, %v274_v18, -inf }
 0x22d   : > { %v276_v20 = vrot.slane %v275_v19, 4 }
 0x22f   : > { %v277_v21 = vmax.f32 %v275_v19, %v276_v20 }
 0x231   : > { %v278_v22 = vrot.slane %v277_v21, 2 }
 0x233   : > { %v279_v23 = vmax.f32 %v277_v21, %v278_v22 }
 0x235   : > { %v280_v24 = vrot.slane %v279_v23, 1 }
 0x237   : > { %v281_v25 = vmax.f32 %v279_v23, %v280_v24 }
 0x239   : > { %v282_v26 = vsub.f32 %v274_v18, %v281_v25 }
 0x23b   : > { %v283_v27 = vmul.f32 1.442695, %v282_v26 }
 0x23d   : > { %496 = vpow2.f32 %v283_v27 }
 0x247   : > { %v497_v28 = vpop.eup %496 }
 0x248   : > { %v285_v29 = vsel %vm233_vm5, %v497_v28, 0.0 }
 0x249   : > { %v286_v30 = vrot.slane %v285_v29, 4 }
 0x24b   : > { %v287_v31 = vadd.f32 %v286_v30, %v285_v29 }
 0x24d   : > { %v288_v32 = vrot.slane %v287_v31, 2 }
 0x24f   : > { %v289_v33 = vadd.f32 %v288_v32, %v287_v31 }
 0x251   : > { %v290_v34 = vrot.slane %v289_v33, 1 }
 0x253   : > { %v291_v35 = vadd.f32 %v290_v34, %v289_v33 }
 0x255   : > { %498 = vlog2.f32 %v291_v35 }
 0x25f   : > { %v499_v36 = vpop.eup %498 }
 0x260   : > { %v293_v37 = vmul.f32 0.6931472, %v499_v36 }
 0x262   : > { %v294_v38 = vadd.f32 %v293_v37, %v281_v25 }
 0x264   : > { %v395_v39 = vadd.f32 -1.0986123, %v294_v38 }
 0x266   : > { %v296_v40 = vmul.f32 1.442695, %v395_v39  ;;  %v298_v41 = vsub.f32 %v395_v39, %v274_v18 }
 0x268   : > { %500 = vpow2.f32 %v296_v40 }
 0x272   : > { %v501_v42 = vpop.eup %500 }
 0x273   : > { %v299_v43 = vmul.f32 %v501_v42, %v298_v41 }
 0x275   : > { %v300_v44 = vsel %vm233_vm5, %v299_v43, 0.0 }
 0x276   : > { %301 = vadd.xlane.f32.xlu0 %v300_v44 }
 0x303   : > { %v302_v45 = vpop.xlane.xlu0 %301 }
 0x304   : > { %v303_v46 = vrot.slane %v302_v45, 4 }
 0x306   : > { %v304_v47 = vadd.f32 %v303_v46, %v302_v45 }
 0x308   : > { %v305_v48 = vrot.slane %v304_v47, 2 }
 0x30a   : > { %v306_v49 = vadd.f32 %v305_v48, %v304_v47 }
 0x30c   : > { %v307_v50 = vrot.slane %v306_v49, 1 }
 0x30e   : > { %v308_v51 = vadd.f32 %v307_v50, %v306_v49 }
 0x310   : > { %400 = vpush %v308_v51 }
 0x341   : > { %s401_s22 = spop %400 }
 0x342   : > { %s310_s3 = smul.f32 0.020833334, %s401_s22 }
 0x344   : > { %v311_v52 = vstv %s310_s3 }
 0x345   : > { %313 = vst.msk [vmem:[%s156_s18] sm:$0x1] %vm312_vm7, %v311_v52 }
 0x346 PF: > { %s19_s0 = sadd.s32 1, %s610_s0   ;;  %s839_s19 = smov %s586_s20 }
 0x347   : > { %p16_p6 = scmp.ge.s32.totalorder %s19_s0, 6   ;;  %s840_s20 = smov %s590_s21 }
 0x348   : > { %s841_s21 = smov %s723_s14  ;;  %s842_s22 = smov %s602_s24 }
 0x349   : > { %s843_s23 = smov %s606_s25  ;;  %s844_s24 = smov %s847_s26 }
 0x34a   : > { %s845_s25 = smov %s851_s27  ;;  %18 = sbr.rel (!%p16_p6) target bundleno = 17 (0x11), region = 72 }
 0x351   :  { %331 = vsyncpa [#allocation7], 1 }
 0x352   :  { %333 = vsyncpa [#allocation7 + $0x1], 1 }

</bundles_post_ra>
